<compile_context>
chip_gen: v7x
topology: tpu7x:2x2x1
jax: 0.10.0
libtpu: 0.0.40
codegen_flags: <defaults>
</compile_context>

<pallas_src>
import jax
import jax.numpy as jnp
import numpy as np
from jax.experimental import pallas as pl
from jax.experimental.pallas import tpu as pltpu

EPS = 1e-5        # PyTorch BatchNorm1d default eps
LANE = 128        # lane width
SUBLANE = 8       # f32 sublane


def _round_up(n, m):
    return ((n + m - 1) // m) * m


# ----------------------------------------------------------------------------- kernel
def _mlp_kernel(x_ref, w1_ref, b1_ref, ws_ref, bs_ref, wot_ref, bot_ref, out_ref):
    def silu(h):
        # h * sigmoid(h) with a single transcendental (tanh) on the EUP;
        # the mul/adds ride the VPU which has slack.
        return 0.5 * h * (jnp.tanh(0.5 * h) + 1.0)

    # first (bn1+bn2 folded) layer: bf16 operands straight from HBM, f32 accumulation
    h = jnp.dot(x_ref[...], w1_ref[...],
                preferred_element_type=jnp.float32) + b1_ref[...]
    h = silu(h)

    # middle (bn2 folded) layers: weights stacked as (n_mid, H_p, H_p) bf16
    n_mid = ws_ref.shape[0]

    def body(i, h):
        w = ws_ref[i]                       # (H_p, H_p) bf16
        b = bs_ref[i]                       # (1, H_p)   f32
        h = jnp.dot(h.astype(w.dtype), w, preferred_element_type=jnp.float32) + b
        return silu(h)

    h = jax.lax.fori_loop(0, n_mid, body, h, unroll=(n_mid <= 4))

    # final hidden->1 projection, computed transposed on the MXU so the per-row
    # scalar lands lane-dense: yt[o, b] = sum_k wot[o, k] * h[b, k]; row 0 is real.
    yt = jnp.einsum('ok,bk->ob', wot_ref[...], h.astype(wot_ref.dtype),
                    preferred_element_type=jnp.float32) + bot_ref[...]
    out_ref[...] = yt[:1, :]                # (1, TB) lane-dense f32 store


# --------------------------------------------------------------------- parameter prep
def pack_params(params, compute_dtype=jnp.bfloat16):
    """Fold bn1/bn2 into the Linear weights, pad hidden dim to 128, cast to bf16."""
    g1, be1, rm1, rv1 = params["bn1_g"], params["bn1_b"], params["bn1_rm"], params["bn1_rv"]
    g2, be2, rm2, rv2 = params["bn2_g"], params["bn2_b"], params["bn2_rm"], params["bn2_rv"]

    s1 = g1 * jax.lax.rsqrt(rv1 + EPS)          # (1, Din)
    t1 = be1 - rm1 * s1
    s2 = g2 * jax.lax.rsqrt(rv2 + EPS)          # (1, H)
    t2 = be2 - rm2 * s2

    layers = params["layers"]
    assert len(layers) >= 2, "n_layers must be > 2"

    w1, b1 = layers[0]                          # (Din, H), (1, H)
    Din, H = w1.shape
    # bn1 folded on the input side, bn2 folded on the output side
    w1_eff = (w1 * s1.T) * s2
    b1_eff = (t1 @ w1 + b1) * s2 + t2

    mids = [((w * s2), (b * s2 + t2)) for (w, b) in layers[1:]]

    Din_p = _round_up(Din, 16)                  # bf16 sublane pack of w1 rows (16 -> no pad)
    H_p = _round_up(H, LANE)                    # lane-dense hidden dim

    def pad2(a, r, c):
        return jnp.pad(a, ((0, r - a.shape[0]), (0, c - a.shape[1])))

    w1_p = pad2(w1_eff, Din_p, H_p).astype(compute_dtype)
    b1_p = pad2(b1_eff, 1, H_p).astype(jnp.float32)
    ws_p = jnp.stack([pad2(w, H_p, H_p) for (w, _) in mids]).astype(compute_dtype)
    bs_p = jnp.stack([pad2(b, 1, H_p) for (_, b) in mids]).astype(jnp.float32)   # (n_mid,1,H_p)

    # transposed final projection: row 0 = w_out, rows 1..7 are zero padding
    wot_p = jnp.zeros((SUBLANE, H_p), jnp.float32)
    wot_p = wot_p.at[0, :H].set(params["w_out"][:, 0]).astype(compute_dtype)
    bot_p = jnp.zeros((SUBLANE, 1), jnp.float32).at[0, 0].set(params["b_out"][0, 0])

    return {"w1": w1_p, "b1": b1_p, "ws": ws_p, "bs": bs_p, "wot": wot_p, "bot": bot_p,
            "din": Din, "din_p": Din_p, "h_p": H_p}


# --------------------------------------------------------------------------- wrapper
def mlp_forward(x, packed):
    B, Din = x.shape
    Din_p, H_p = packed["din_p"], packed["h_p"]
    n_mid = packed["ws"].shape[0]

    # resident parameter bytes (x2 because the default pipeliner double-buffers
    # even constant-index inputs)
    w_bytes = 2 * ((packed["w1"].size + packed["ws"].size + packed["wot"].size) * 2
                   + (packed["b1"].size + packed["bs"].size + packed["bot"].size) * 4)

    # per-generation VMEM budget: ~80% of physical capacity (v5e/v6e 128 MiB, v7x 64 MiB)
    try:
        vmem_cap = int(pltpu.get_tpu_info().vmem_capacity_bytes)
    except Exception:
        vmem_cap = 64 << 20                       # conservative: fits every generation
    vmem_budget = int(vmem_cap * 0.8)

    def tile_bytes(tb):
        x_tile = 2 * tb * Din_p * 2               # double-buffered bf16 x tile
        o_tile = 2 * tb * 4                       # double-buffered packed f32 output row
        live = 3 * tb * H_p * 4                   # f32 h + bf16 copy + matmul temps
        return x_tile + o_tile + live + (4 << 20)

    # batch tile: biggest of {1024,512,256,128} that fits VMEM AND leaves >=2 grid
    # steps (v7x has 2 TensorCores; "parallel" only helps with >=2 grid points).
    if B > LANE:
        TB = LANE
        for cand in (1024, 512, 256):
            if B >= 2 * cand and w_bytes + tile_bytes(cand) <= vmem_budget:
                TB = cand
                break
    else:
        TB = _round_up(B, SUBLANE)                # tiny batch -> single tile, grid == 1
    B_p = _round_up(B, TB)

    # single fused pad + bf16 cast copy of x (no extra f32 materialization)
    pad_b, pad_d = B_p - B, Din_p - Din
    x_p = jnp.pad(x, ((0, pad_b), (0, pad_d))) if (pad_b or pad_d) else x
    x_p = x_p.astype(jnp.bfloat16)

    vmem_limit = int(min(max(w_bytes + tile_bytes(TB), 32 << 20), vmem_budget))

    out = pl.pallas_call(
        _mlp_kernel,
        out_shape=jax.ShapeDtypeStruct((1, B_p), jnp.float32),
        grid_spec=pltpu.PrefetchScalarGridSpec(
            num_scalar_prefetch=0,
            grid=(B_p // TB,),
            in_specs=[
                pl.BlockSpec((TB, Din_p), lambda i: (i, 0)),              # bf16 x tile
                pl.BlockSpec((Din_p, H_p), lambda i: (0, 0)),             # w1 (resident)
                pl.BlockSpec((1, H_p), lambda i: (0, 0)),                 # b1
                pl.BlockSpec((n_mid, H_p, H_p), lambda i: (0, 0, 0)),     # stacked Ws
                pl.BlockSpec((n_mid, 1, H_p), lambda i: (0, 0, 0)),       # stacked bs
                pl.BlockSpec((SUBLANE, H_p), lambda i: (0, 0)),           # w_out^T (row 0 real)
                pl.BlockSpec((SUBLANE, 1), lambda i: (0, 0)),             # b_out (row 0 real)
            ],
            out_specs=pl.BlockSpec((1, TB), lambda i: (0, i)),            # lane-dense packed out
        ),
        compiler_params=pltpu.CompilerParams(
            dimension_semantics=("parallel",),
            vmem_limit_bytes=vmem_limit,
        ),
    )(x_p, packed["w1"], packed["b1"], packed["ws"], packed["bs"],
      packed["wot"], packed["bot"])

    return out[0, :B].reshape(B, 1)


# ------------------------------------------------------------------------- reference
def mlp_reference(x, params):
    """Pure-JAX f32 reference (unfolded BN, eval mode)."""
    x = x.astype(jnp.float32)
    x = (x - params["bn1_rm"]) / jnp.sqrt(params["bn1_rv"] + EPS) * params["bn1_g"] + params["bn1_b"]
    for w, b in params["layers"]:
        h = x @ w + b
        h = (h - params["bn2_rm"]) / jnp.sqrt(params["bn2_rv"] + EPS) * params["bn2_g"] + params["bn2_b"]
        x = h * jax.nn.sigmoid(h)
    return x @ params["w_out"] + params["b_out"]


def init_params(key, input_dim, hidden_dim, n_layers):
    assert n_layers > 2
    keys = iter(jax.random.split(key, 4 * n_layers + 16))

    def linear(fan_in, fan_out):
        k = 1.0 / np.sqrt(fan_in)
        w = jax.random.uniform(next(keys), (fan_in, fan_out), jnp.float32, -k, k)  # (in, out)
        b = jax.random.uniform(next(keys), (1, fan_out), jnp.float32, -k, k)
        return w, b

    def bn(dim):
        g = jax.random.uniform(next(keys), (1, dim), jnp.float32, 0.5, 1.5)
        b = 0.1 * jax.random.normal(next(keys), (1, dim), jnp.float32)
        rm = 0.1 * jax.random.normal(next(keys), (1, dim), jnp.float32)
        rv = jax.random.uniform(next(keys), (1, dim), jnp.float32, 0.5, 1.5)
        return g, b, rm, rv

    g1, b1, rm1, rv1 = bn(input_dim)
    g2, b2, rm2, rv2 = bn(hidden_dim)

    layers = [linear(input_dim, hidden_dim)]
    for _ in range(n_layers - 2):
        layers.append(linear(hidden_dim, hidden_dim))
    w_out, b_out = linear(hidden_dim, 1)

    return {
        "bn1_g": g1, "bn1_b": b1, "bn1_rm": rm1, "bn1_rv": rv1,
        "bn2_g": g2, "bn2_b": b2, "bn2_rm": rm2, "bn2_rv": rv2,
        "layers": layers,
        "w_out": w_out, "b_out": b_out,
    }


if __name__ == "__main__":
    batch, input_dim, hidden_dim, n_layers = 8, 16, 32, 4

    key = jax.random.PRNGKey(0)
    k_x, k_p = jax.random.split(key)
    x = jax.random.normal(k_x, (batch, input_dim), jnp.float32)
    params = init_params(k_p, input_dim, hidden_dim, n_layers)

    packed = pack_params(params)          # BN folding + padding + bf16 cast (one time)
    out = mlp_forward(x, packed)
    out = jax.block_until_ready(out)

    ref = mlp_reference(x, params)
    # bf16 matmul operands -> loosened tolerance vs the f32 reference
    np.testing.assert_allclose(np.asarray(out), np.asarray(ref), rtol=5e-2, atol=5e-2)
    assert out.shape == (batch, 1)

    print("KERNEL_OK")
</pallas_src>

<mosaic_0001>
module attributes {stable_mosaic.version = 11 : i64} {
  func.func @_mlp_kernel(%arg0: i32, %arg1: memref<8x16xbf16, #tpu.memory_space<vmem>>, %arg2: memref<16x128xbf16, #tpu.memory_space<vmem>>, %arg3: memref<1x128xf32, #tpu.memory_space<vmem>>, %arg4: memref<2x128x128xbf16, #tpu.memory_space<vmem>>, %arg5: memref<2x1x128xf32, #tpu.memory_space<vmem>>, %arg6: memref<8x128xbf16, #tpu.memory_space<vmem>>, %arg7: memref<8x1xf32, #tpu.memory_space<vmem>>, %arg8: memref<1x8xf32, #tpu.memory_space<vmem>>) attributes {dimension_semantics = [#tpu.dimension_semantics<parallel>], iteration_bounds = array<i64: 1>, scalar_prefetch = 0 : i64, scratch_operands = 0 : i64, tpu.core_type = #tpu.core_type<tc>, window_params = [{transform_indices = @transform_0, window_bounds = array<i64: 8, 16>}, {pipeline_mode = #tpu.pipeline_mode<synchronous>, transform_indices = @transform_1, window_bounds = array<i64: 16, 128>}, {pipeline_mode = #tpu.pipeline_mode<synchronous>, transform_indices = @transform_2, window_bounds = array<i64: 1, 128>}, {pipeline_mode = #tpu.pipeline_mode<synchronous>, transform_indices = @transform_3, window_bounds = array<i64: 2, 128, 128>}, {pipeline_mode = #tpu.pipeline_mode<synchronous>, transform_indices = @transform_4, window_bounds = array<i64: 2, 1, 128>}, {pipeline_mode = #tpu.pipeline_mode<synchronous>, transform_indices = @transform_5, window_bounds = array<i64: 8, 128>}, {pipeline_mode = #tpu.pipeline_mode<synchronous>, transform_indices = @transform_6, window_bounds = array<i64: 8, 1>}, {transform_indices = @transform_7, window_bounds = array<i64: 1, 8>}]} {
    %c0 = arith.constant 0 : index
    %c0_0 = arith.constant 0 : index
    %0 = vector.load %arg1[%c0, %c0_0] : memref<8x16xbf16, #tpu.memory_space<vmem>>, vector<8x16xbf16>
    %c0_1 = arith.constant 0 : index
    %c0_2 = arith.constant 0 : index
    %1 = vector.load %arg2[%c0_1, %c0_2] : memref<16x128xbf16, #tpu.memory_space<vmem>>, vector<16x128xbf16>
    %cst = arith.constant dense<0.000000e+00> : vector<8x128xf32>
    %2 = tpu.matmul %0, %1, %cst {dimension_numbers = #tpu.dot_dimension_numbers<[1], [0], [0], [1], [0, 0, 1, 1], [], []>} : vector<8x16xbf16>, vector<16x128xbf16>, vector<8x128xf32> -> vector<8x128xf32>
    %c0_3 = arith.constant 0 : index
    %c0_4 = arith.constant 0 : index
    %3 = vector.load %arg3[%c0_3, %c0_4] : memref<1x128xf32, #tpu.memory_space<vmem>>, vector<1x128xf32>
    %4 = vector.broadcast %3 : vector<1x128xf32> to vector<8x128xf32>
    %5 = arith.addf %2, %4 : vector<8x128xf32>
    %cst_5 = arith.constant 5.000000e-01 : f32
    %6 = vector.broadcast %cst_5 : f32 to vector<8x128xf32>
    %7 = arith.mulf %6, %5 : vector<8x128xf32>
    %cst_6 = arith.constant 5.000000e-01 : f32
    %8 = vector.broadcast %cst_6 : f32 to vector<8x128xf32>
    %9 = arith.mulf %8, %5 : vector<8x128xf32>
    %10 = math.tanh %9 : vector<8x128xf32>
    %cst_7 = arith.constant 1.000000e+00 : f32
    %11 = vector.broadcast %cst_7 : f32 to vector<8x128xf32>
    %12 = arith.addf %10, %11 : vector<8x128xf32>
    %13 = arith.mulf %7, %12 : vector<8x128xf32>
    %c0_i32 = arith.constant 0 : i32
    %14 = arith.index_cast %c0_i32 : i32 to index
    %c0_8 = arith.constant 0 : index
    %c0_9 = arith.constant 0 : index
    %15 = vector.load %arg4[%14, %c0_8, %c0_9] : memref<2x128x128xbf16, #tpu.memory_space<vmem>>, vector<1x128x128xbf16>
    %16 = vector.shape_cast %15 : vector<1x128x128xbf16> to vector<128x128xbf16>
    %17 = arith.index_cast %c0_i32 : i32 to index
    %c0_10 = arith.constant 0 : index
    %c0_11 = arith.constant 0 : index
    %18 = vector.load %arg5[%17, %c0_10, %c0_11] : memref<2x1x128xf32, #tpu.memory_space<vmem>>, vector<1x1x128xf32>
    %19 = vector.shape_cast %18 : vector<1x1x128xf32> to vector<1x128xf32>
    %20 = arith.truncf %13 : vector<8x128xf32> to vector<8x128xbf16>
    %cst_12 = arith.constant dense<0.000000e+00> : vector<8x128xf32>
    %21 = tpu.matmul %20, %16, %cst_12 {dimension_numbers = #tpu.dot_dimension_numbers<[1], [0], [0], [1], [0, 0, 1, 1], [], []>} : vector<8x128xbf16>, vector<128x128xbf16>, vector<8x128xf32> -> vector<8x128xf32>
    %22 = vector.broadcast %19 : vector<1x128xf32> to vector<8x128xf32>
    %23 = arith.addf %21, %22 : vector<8x128xf32>
    %cst_13 = arith.constant 5.000000e-01 : f32
    %24 = vector.broadcast %cst_13 : f32 to vector<8x128xf32>
    %25 = arith.mulf %24, %23 : vector<8x128xf32>
    %cst_14 = arith.constant 5.000000e-01 : f32
    %26 = vector.broadcast %cst_14 : f32 to vector<8x128xf32>
    %27 = arith.mulf %26, %23 : vector<8x128xf32>
    %28 = math.tanh %27 : vector<8x128xf32>
    %cst_15 = arith.constant 1.000000e+00 : f32
    %29 = vector.broadcast %cst_15 : f32 to vector<8x128xf32>
    %30 = arith.addf %28, %29 : vector<8x128xf32>
    %31 = arith.mulf %25, %30 : vector<8x128xf32>
    %c1_i32 = arith.constant 1 : i32
    %32 = arith.index_cast %c1_i32 : i32 to index
    %c0_16 = arith.constant 0 : index
    %c0_17 = arith.constant 0 : index
    %33 = vector.load %arg4[%32, %c0_16, %c0_17] : memref<2x128x128xbf16, #tpu.memory_space<vmem>>, vector<1x128x128xbf16>
    %34 = vector.shape_cast %33 : vector<1x128x128xbf16> to vector<128x128xbf16>
    %35 = arith.index_cast %c1_i32 : i32 to index
    %c0_18 = arith.constant 0 : index
    %c0_19 = arith.constant 0 : index
    %36 = vector.load %arg5[%35, %c0_18, %c0_19] : memref<2x1x128xf32, #tpu.memory_space<vmem>>, vector<1x1x128xf32>
    %37 = vector.shape_cast %36 : vector<1x1x128xf32> to vector<1x128xf32>
    %38 = arith.truncf %31 : vector<8x128xf32> to vector<8x128xbf16>
    %cst_20 = arith.constant dense<0.000000e+00> : vector<8x128xf32>
    %39 = tpu.matmul %38, %34, %cst_20 {dimension_numbers = #tpu.dot_dimension_numbers<[1], [0], [0], [1], [0, 0, 1, 1], [], []>} : vector<8x128xbf16>, vector<128x128xbf16>, vector<8x128xf32> -> vector<8x128xf32>
    %40 = vector.broadcast %37 : vector<1x128xf32> to vector<8x128xf32>
    %41 = arith.addf %39, %40 : vector<8x128xf32>
    %cst_21 = arith.constant 5.000000e-01 : f32
    %42 = vector.broadcast %cst_21 : f32 to vector<8x128xf32>
    %43 = arith.mulf %42, %41 : vector<8x128xf32>
    %cst_22 = arith.constant 5.000000e-01 : f32
    %44 = vector.broadcast %cst_22 : f32 to vector<8x128xf32>
    %45 = arith.mulf %44, %41 : vector<8x128xf32>
    %46 = math.tanh %45 : vector<8x128xf32>
    %cst_23 = arith.constant 1.000000e+00 : f32
    %47 = vector.broadcast %cst_23 : f32 to vector<8x128xf32>
    %48 = arith.addf %46, %47 : vector<8x128xf32>
    %49 = arith.mulf %43, %48 : vector<8x128xf32>
    %c2_i32 = arith.constant 2 : i32
    %c0_24 = arith.constant 0 : index
    %c0_25 = arith.constant 0 : index
    %50 = vector.load %arg6[%c0_24, %c0_25] : memref<8x128xbf16, #tpu.memory_space<vmem>>, vector<8x128xbf16>
    %51 = arith.truncf %49 : vector<8x128xf32> to vector<8x128xbf16>
    "tpu.trace_start"() <{level = 10 : i32, message = "ok,bk->ob"}> : () -> ()
    %cst_26 = arith.constant dense<0.000000e+00> : vector<8x8xf32>
    %52 = tpu.matmul %50, %51, %cst_26 {dimension_numbers = #tpu.dot_dimension_numbers<[1], [1], [0], [0], [0, 0, 1, 0], [], []>} : vector<8x128xbf16>, vector<8x128xbf16>, vector<8x8xf32> -> vector<8x8xf32>
    "tpu.trace_stop"() : () -> ()
    %c0_27 = arith.constant 0 : index
    %c0_28 = arith.constant 0 : index
    %53 = vector.load %arg7[%c0_27, %c0_28] : memref<8x1xf32, #tpu.memory_space<vmem>>, vector<8x1xf32>
    %54 = vector.broadcast %53 : vector<8x1xf32> to vector<8x8xf32>
    %55 = arith.addf %52, %54 : vector<8x8xf32>
    %56 = vector.extract_strided_slice %55 {offsets = [0, 0], sizes = [1, 8], strides = [1, 1]} : vector<8x8xf32> to vector<1x8xf32>
    %c0_29 = arith.constant 0 : index
    %c0_30 = arith.constant 0 : index
    %57 = vector.load %arg8[%c0_29, %c0_30] : memref<1x8xf32, #tpu.memory_space<vmem>>, vector<1x8xf32>
    tpu.vector_store %arg8[%c0_29, %c0_30], %56 {strides = array<i32>} : memref<1x8xf32, #tpu.memory_space<vmem>>, vector<1x8xf32>,
    return
  }
  func.func @transform_0(%arg0: i32) -> (i32, i32) {
    %c0_i32 = arith.constant 0 : i32
    %c0_i32_0 = arith.constant 0 : i32
    return %arg0, %c0_i32 : i32, i32
  }
  func.func @transform_1(%arg0: i32) -> (i32, i32) {
    %c0_i32 = arith.constant 0 : i32
    %c0_i32_0 = arith.constant 0 : i32
    %c0_i32_1 = arith.constant 0 : i32
    return %c0_i32, %c0_i32_0 : i32, i32
  }
  func.func @transform_2(%arg0: i32) -> (i32, i32) {
    %c0_i32 = arith.constant 0 : i32
    %c0_i32_0 = arith.constant 0 : i32
    %c0_i32_1 = arith.constant 0 : i32
    return %c0_i32, %c0_i32_0 : i32, i32
  }
  func.func @transform_3(%arg0: i32) -> (i32, i32, i32) {
    %c0_i32 = arith.constant 0 : i32
    %c0_i32_0 = arith.constant 0 : i32
    %c0_i32_1 = arith.constant 0 : i32
    %c0_i32_2 = arith.constant 0 : i32
    return %c0_i32, %c0_i32_0, %c0_i32_1 : i32, i32, i32
  }
  func.func @transform_4(%arg0: i32) -> (i32, i32, i32) {
    %c0_i32 = arith.constant 0 : i32
    %c0_i32_0 = arith.constant 0 : i32
    %c0_i32_1 = arith.constant 0 : i32
    %c0_i32_2 = arith.constant 0 : i32
    return %c0_i32, %c0_i32_0, %c0_i32_1 : i32, i32, i32
  }
  func.func @transform_5(%arg0: i32) -> (i32, i32) {
    %c0_i32 = arith.constant 0 : i32
    %c0_i32_0 = arith.constant 0 : i32
    %c0_i32_1 = arith.constant 0 : i32
    return %c0_i32, %c0_i32_0 : i32, i32
  }
  func.func @transform_6(%arg0: i32) -> (i32, i32) {
    %c0_i32 = arith.constant 0 : i32
    %c0_i32_0 = arith.constant 0 : i32
    %c0_i32_1 = arith.constant 0 : i32
    return %c0_i32, %c0_i32_0 : i32, i32
  }
  func.func @transform_7(%arg0: i32) -> (i32, i32) {
    %c0_i32 = arith.constant 0 : i32
    %c0_i32_0 = arith.constant 0 : i32
    return %c0_i32, %arg0 : i32, i32
  }
}

</mosaic_0001>

<bundles_post_ra>
// kernel: tpu_custom_call.1
= control target key start
LH: loop header
LB: loop body
LE: loop exit
PB: predicated region body
PF: predicated region fallthrough
CT: control target
= control target key end

     0   :  { %12 = vsyncpa [#allocation3], 0  ;;  %s753_s0 = inlined_call_operand.vmem [shape: bf16[8,16], index: 0, kind: input, shape index: {}]   ;;  %s754_s1 = inlined_call_operand.vmem [shape: bf16[16,128], index: 1, kind: input, shape index: {}]   ;;  %s755_s2 = inlined_call_operand.hbm [shape: f32[1,128], index: 2, kind: input, shape index: {}]   ;;  %s756_s3 = inlined_call_operand.hbm [shape: bf16[2,128,128], index: 3, kind: input, shape index: {}]   ;;  %s757_s4 = inlined_call_operand.vmem [shape: f32[2,1,128], index: 4, kind: input, shape index: {}]   ;;  %s758_s5 = inlined_call_operand.vmem [shape: bf16[8,128], index: 5, kind: input, shape index: {}]   ;;  %s759_s6 = inlined_call_operand.vmem [shape: f32[8,1], index: 6, kind: input, shape index: {}]   ;;  %s760_s7 = inlined_call_operand.hbm [shape: f32[1,8], index: 7, kind: output, shape index: {}]  }
   0x1   :  { %13 = vsyncpa [#allocation6], 0 }
   0x2   :  { %14 = vsyncpa [#allocation4], 0  ;;  %s618_s24 = smov [#allocation2]   ;;  %s619_s26 = smov [#allocation5]  }
   0x3   :  { %s25_s25 = sshll.u32 %s618_s24, 4  ;;  %s34_s27 = sshll.u32 %s619_s26, 4  ;;  %s26_s25 = int_to_ptr.vmem [resolvable:$true] %s25_s25  ;;  %s666_s27 = int_to_ptr.vmem [resolvable:$true] %s34_s27 }
   0x4   :  { %s546_s30 = scalar_lea.hbm %s755_s2, 16 }
   0x5   :  { %p547_p0 = scmp.ne.s32.totalorder %s755_s2, %s546_s30  ;;  %p550_p1 = scmp.lt.u32.totalorder %s546_s30, %s755_s2 }
   0x7   :  { %p552_p2 = pnand %p550_p1, %p547_p0 }
   0x9   :  { %555 = shalt.err (!%p552_p2)
}
   0xa   :  { %s556_s12 = scalar_lea.vmem %s26_s25, 16  ;;  %s560_s13 = scalar_lea.vmem %s26_s25, 32 }
   0xb   :  { %p557_p3 = scmp.ne.s32.totalorder %s26_s25, %s556_s12  ;;  %p561_p4 = scmp.lt.s32.totalorder %s26_s25, %s26_s25 }
   0xc   :  { %p562_p5 = scmp.lt.s32.totalorder %s560_s13, %s556_s12 }
   0xe   :  { %p563_p6 = por %p562_p5, %p561_p4 }
  0x10   :  { %p564_p7 = pnand %p563_p6, %p557_p3 }
  0x12   :  { %567 = shalt.err (!%p564_p7)
}
  0x13   :  { %28 = dma.hbm_to_vmem [thread:$0]  %s755_s2, 16, %s26_s25, [#allocation3]  }
  0x14   :  { %s568_s18 = scalar_lea.hbm %s756_s3, 2048 }
  0x15   :  { %p569_p8 = scmp.ne.s32.totalorder %s756_s3, %s568_s18  ;;  %p572_p9 = scmp.lt.u32.totalorder %s568_s18, %s756_s3 }
  0x17   :  { %p574_p10 = pnand %p572_p9, %p569_p8 }
  0x19   :  { %577 = shalt.err (!%p574_p10)
}
  0x1a   :  { %s578_s23 = scalar_lea.vmem %s666_s27, 2048  ;;  %p583_p12 = scmp.lt.s32.totalorder %s666_s27, %s666_s27 }
  0x1b   :  { %p579_p11 = scmp.ne.s32.totalorder %s666_s27, %s578_s23  ;;  %p584_p13 = scmp.lt.s32.totalorder %s578_s23, %s578_s23 }
  0x1d   :  { %p585_p0 = por %p584_p13, %p583_p12 }
  0x1f   :  { %p586_p1 = pnand %p585_p0, %p579_p11 }
  0x21   :  { %589 = shalt.err (!%p586_p1)
}
  0x22   :  { %s620_s2 = smov 64   ;;  %s621_s24 = smov 4  }
  0x23   :  { %40 = dma.hbm_to_vmem [thread:$0]  %s756_s3, 2048, %s666_s27, [#allocation6], %s620_s2, %s620_s2, %s621_s24  }
  0x24   :  { %612 = dma.done.wait [#allocation3], 16  }
  0x25   :  { %613 = vsyncadd [#allocation3], 4294967280 }
  0x26   :  { %614 = dma.done.wait [#allocation6], 2048  }
  0x27   :  { %615 = vsyncadd [#allocation6], 4294965248  ;;  %v622_v0 = vmov 0.0   ;;  %vm623_vm0 = vmmov 0   ;;  %v523_v1 = vld [vmem:[%s754_s1] sm:$0xff]   ;;  %vm70_vm1 = vcmask 130048  }
  0x28   :  { %462 = vmatprep.subr.bf16.mxu0 %v622_v0  ;;  %464 = vmatprep.mubr.msk.bf16.mxu0 %vm623_vm0, %v622_v0  ;;  %v54_v2 = vld [vmem:[%s753_s0] sm:$0xf]  ;;  %v525_v4 = vld [vmem:[#allocation5 + $0x8] sm:$0xff]   ;;  %v526_v5 = vld [vmem:[#allocation5 + $0x10] sm:$0xff]   ;;  %v624_v42 = vmov 0   ;;  %s625_s12 = smov [#allocation7]  }
  0x29   :  { %468 = vmatprep.subr.bf16.mxu1 %v622_v0  ;;  %484 = vmatprep.mubr.msk.bf16.mxu1 %vm623_vm0, %v622_v0  ;;  %v524_v3 = vld [vmem:[#allocation5] sm:$0xff]   ;;  %v527_v6 = vld [vmem:[#allocation5 + $0x18] sm:$0xff]   ;;  %v529_v8 = vld [vmem:[#allocation5 + $0x28] sm:$0xff]   ;;  %vm400_vm2 = vcmask 57344  }
  0x2a   :  { %463 = vmatpush3.bf16.msra.mxu0 %v523_v1  ;;  %469 = vmatpush3.bf16.msra.mxu1 %v524_v3  ;;  %v528_v7 = vld [vmem:[#allocation5 + $0x20] sm:$0xff]   ;;  %v530_v9 = vld [vmem:[#allocation5 + $0x30] sm:$0xff]   ;;  %v531_v10 = vld [vmem:[#allocation5 + $0x38] sm:$0xff]  }
  0x2b   :  { %488 = vmatprep.subr.bf16.mxu0 %v622_v0  ;;  %470 = vmatprep.subr.bf16.mxu1 %v622_v0  ;;  %v532_v11 = vld [vmem:[#allocation5 + $0x40] sm:$0xff]   ;;  %v533_v12 = vld [vmem:[#allocation5 + $0x48] sm:$0xff]   ;;  %v534_v13 = vld [vmem:[#allocation5 + $0x50] sm:$0xff]  }
  0x2c   :  { %v418_v14 = vld [vmem:[#allocation2] ss:$0 sm:$0xff]  ;;  %v536_v26 = vld [vmem:[#allocation5 + $0x60] sm:$0xff]   ;;  %v537_v27 = vld [vmem:[#allocation5 + $0x68] sm:$0xff]   ;;  %522 = vset.pattern.permute.xlu0 %v624_v42 }
  0x2d   :  { %465 = vmatmul.mubr.msk.bf16.vlgmr.msra.gmra.mrb[0].mxu0 %vm70_vm1, %v54_v2  ;;  %v535_v25 = vld [vmem:[#allocation5 + $0x58] sm:$0xff]   ;;  %v538_v28 = vld [vmem:[#allocation5 + $0x70] sm:$0xff]  }
  0x2e   :  { %504 = vmatprep.mubr.msk.bf16.mxu0 %vm623_vm0, %v622_v0  ;;  %471 = vmatpush3.bf16.msra.mxu1 %v525_v4  ;;  %v539_v29 = vld [vmem:[#allocation5 + $0x78] sm:$0xff]  }
  0x2f   :  { %472 = vmatprep.subr.bf16.mxu1 %v622_v0  ;;  %489 = vmatpush3.bf16.msra.mxu0 %v532_v11  ;;  %v421_v30 = vld [vmem:[%s757_s4] ss:$0 sm:$0xff]  ;;  %v431_v43 = vld [vmem:[%s757_s4 + $0x1] ss:$0 sm:$0xff]  ;;  %s408_s4 = sshll.u32 %s625_s12, 4  ;;  %s409_s4 = int_to_ptr.vmem [resolvable:$true] %s408_s4 }
  0x30   :  { %490 = vmatprep.subr.bf16.mxu0 %v622_v0  ;;  %v354_v41 = vld [vmem:[%s759_s6] sm:$0xff]  ;;  %s590_s13 = scalar_lea.vmem %s409_s4, 16  ;;  %s594_s14 = scalar_lea.vmem %s409_s4, 32 }
  0x31   :  { %357 = vperm.xlu0 %522, %v354_v41   ;;  %v352_v54 = vld [vmem:[%s758_s5] sm:$0xf]  ;;  %p591_p2 = scmp.ne.s32.totalorder %s409_s4, %s590_s13  ;;  %p595_p3 = scmp.lt.s32.totalorder %s409_s4, %s409_s4 }
  0x32   :  { %473 = vmatpush3.bf16.msra.mxu1 %v526_v5  ;;  %p596_p4 = scmp.lt.s32.totalorder %s594_s14, %s590_s13 }
  0x33   :  { %474 = vmatprep.subr.bf16.mxu1 %v622_v0  ;;  %491 = vmatpush3.bf16.msra.mxu0 %v533_v12 }
  0x34   :  { %492 = vmatprep.subr.bf16.mxu0 %v622_v0  ;;  %p597_p5 = por %p596_p4, %p595_p3 }
  0x36   :  { %475 = vmatpush3.bf16.msra.mxu1 %v527_v6  ;;  %p598_p6 = pnand %p597_p5, %p591_p2 }
  0x37   :  { %476 = vmatprep.subr.bf16.mxu1 %v622_v0  ;;  %493 = vmatpush3.bf16.msra.mxu0 %v534_v13 }
  0x38   :  { %494 = vmatprep.subr.bf16.mxu0 %v622_v0 }
  0x3a   :  { %477 = vmatpush3.bf16.msra.mxu1 %v528_v7 }
  0x3b   :  { %478 = vmatprep.subr.bf16.mxu1 %v622_v0  ;;  %495 = vmatpush3.bf16.msra.mxu0 %v535_v25 }
  0x3c   :  { %496 = vmatprep.subr.bf16.mxu0 %v622_v0 }
  0x3e   :  { %479 = vmatpush3.bf16.msra.mxu1 %v529_v8 }
  0x3f   :  { %480 = vmatprep.subr.bf16.mxu1 %v622_v0  ;;  %497 = vmatpush3.bf16.msra.mxu0 %v536_v26 }
  0x40   :  { %498 = vmatprep.subr.bf16.mxu0 %v622_v0 }
  0x42   :  { %481 = vmatpush3.bf16.msra.mxu1 %v530_v9 }
  0x43   :  { %482 = vmatprep.subr.bf16.mxu1 %v622_v0  ;;  %499 = vmatpush3.bf16.msra.mxu0 %v537_v27 }
  0x44   :  { %500 = vmatprep.subr.bf16.mxu0 %v622_v0 }
  0x46   :  { %483 = vmatpush3.bf16.msra.mxu1 %v531_v10 }
  0x47   :  { %508 = vmatprep.subr.bf16.mxu1 %v622_v0  ;;  %501 = vmatpush3.bf16.msra.mxu0 %v538_v28 }
  0x48   :  { %502 = vmatprep.subr.bf16.mxu0 %v622_v0 }
  0x4b   :  { %503 = vmatpush3.bf16.msra.mxu0 %v539_v29 }
  0xb0   :  { %v358_v55 = vpop.permute.xlu0 %357 }
 0x100   :  { %v108_v15 = vpop.f32.mrb[0].mxu0 }
 0x101   :  { %v109_v16 = vadd.f32 %v418_v14, %v108_v15  ;;  %v466_v17 = vpop.f32.mrb[1].mxu0 }
 0x102   :  { %v111_v18 = vpop.f32.mrb[2].mxu0 }
 0x103   :  { %v114_v19 = vmul.f32 0.5, %v109_v16  ;;  %v467_v20 = vpop.f32.mrb[3].mxu0 }
 0x105   :  { %540 = vtanh.f32 %v114_v19 }
 0x10f   :  { %v541_v21 = vpop.eup %540 }
 0x110   :  { %v116_v22 = vadd.f32 1.0, %v541_v21 }
 0x112   :  { %v117_v23 = vmul.f32 %v116_v22, %v114_v19 }
 0x114   :  { %v135_v24 = vpack.c.bf16 %v117_v23, %v117_v23 }
 0x116   :  { %485 = vmatmul.mubr.bf16.vlgmr.msra.gmra.mrb[0].mxu1 %v135_v24 }
 0x117   :  { %510 = vmatprep.mubr.msk.bf16.mxu1 %vm623_vm0, %v622_v0 }
 0x1e9   :  { %v224_v31 = vpop.f32.mrb[0].mxu1 }
 0x1ea   :  { %v225_v32 = vadd.f32 %v421_v30, %v224_v31  ;;  %v486_v33 = vpop.f32.mrb[1].mxu1 }
 0x1eb   :  { %v227_v34 = vpop.f32.mrb[2].mxu1 }
 0x1ec   :  { %v230_v35 = vmul.f32 0.5, %v225_v32  ;;  %v487_v36 = vpop.f32.mrb[3].mxu1 }
 0x1ee   :  { %542 = vtanh.f32 %v230_v35 }
 0x1f8   :  { %v543_v37 = vpop.eup %542 }
 0x1f9   :  { %v232_v38 = vadd.f32 1.0, %v543_v37 }
 0x1fb   :  { %v233_v39 = vmul.f32 %v232_v38, %v230_v35 }
 0x1fd   :  { %v253_v40 = vpack.c.bf16 %v233_v39, %v233_v39 }
 0x1ff   :  { %505 = vmatmul.mubr.bf16.vlgmr.msra.gmra.mrb[4].mxu0 %v253_v40 }
 0x2d2   :  { %v342_v44 = vpop.f32.mrb[4].mxu0 }
 0x2d3   :  { %v343_v45 = vadd.f32 %v431_v43, %v342_v44  ;;  %v506_v46 = vpop.f32.mrb[5].mxu0 }
 0x2d4   :  { %v345_v47 = vpop.f32.mrb[6].mxu0 }
 0x2d5   :  { %v348_v48 = vmul.f32 0.5, %v343_v45  ;;  %v507_v49 = vpop.f32.mrb[7].mxu0 }
 0x2d7   :  { %544 = vtanh.f32 %v348_v48 }
 0x2e1   :  { %v545_v50 = vpop.eup %544 }
 0x2e2   :  { %v350_v51 = vadd.f32 1.0, %v545_v50 }
 0x2e4   :  { %v351_v52 = vmul.f32 %v350_v51, %v348_v48 }
 0x2e6   :  { %v353_v53 = vpack.c.bf16 %v351_v52, %v351_v52 }
 0x2e8   :  { %509 = vmatpush3.bf16.xpose.msra.mxu1 %v353_v53 }
 0x2ef   :  { %511 = vmatmul.mubr.bf16.vlgmr.msra.gmra.mrb[4].mxu1 %v352_v54 }
 0x3c2   :  { %v394_v56 = vpop.f32.mrb[4].mxu1 }
 0x3c3   :  { %v395_v57 = vadd.f32 %v394_v56, %v358_v55  ;;  %v512_v58 = vpop.f32.mrb[5].mxu1 }
 0x3c4   :  { %v397_v59 = vpop.f32.mrb[6].mxu1 }
 0x3c5   :  { %v513_v60 = vpop.f32.mrb[7].mxu1  ;;  %401 = vst.msk [vmem:[#allocation7] sm:$0x1] %vm400_vm2, %v395_v57 }
 0x3c6   :  { %601 = shalt.err (!%p598_p6)
}
 0x3c7   :  { %s602_s16 = scalar_lea.hbm %s760_s7, 16 }
 0x3c8   :  { %p603_p7 = scmp.ne.s32.totalorder %s760_s7, %s602_s16  ;;  %p606_p8 = scmp.lt.u32.totalorder %s602_s16, %s760_s7 }
 0x3ca   :  { %p608_p9 = pnand %p606_p8, %p603_p7 }
 0x3cc   :  { %611 = shalt.err (!%p608_p9)
}
 0x3cd   :  { %411 = dma.vmem_to_hbm [thread:$0]  %s409_s4, 16, %s760_s7, [#allocation4]  }
 0x3ce   :  { %616 = dma.done.wait [#allocation4], 16  }
 0x3cf   :  { %617 = vsyncadd [#allocation4], 4294967280 }
 0x3d0   :  { %415 = vsyncpa [#allocation3], 1 }
 0x3d1   :  { %416 = vsyncpa [#allocation6], 1 }
 0x3d2   :  { %417 = vsyncpa [#allocation4], 1 }

</bundles_post_ra>
